<compile_context>
chip_gen: v5e
topology: v5e:2x2
jax: 0.10.0
libtpu: 0.0.40
codegen_flags: <defaults>
</compile_context>

<pallas_src>
import math
import functools

import numpy as np
import jax
import jax.numpy as jnp
from jax.experimental import pallas as pl
from jax.experimental.pallas import tpu as pltpu


# ----------------------------------------------------------------------------
# Glue: bilinear interpolation weight matrices (PyTorch align_corners=False).
# ----------------------------------------------------------------------------
def _bilinear_matrix(out_size: int, in_size: int) -> np.ndarray:
    """W such that (W @ v) == F.interpolate(v, out_size, mode='bilinear') along one axis."""
    scale = in_size / out_size
    dst = np.arange(out_size, dtype=np.float64)
    src = (dst + 0.5) * scale - 0.5
    src = np.maximum(src, 0.0)                      # PyTorch clamps below at 0
    i0 = np.floor(src).astype(np.int64)
    i0 = np.minimum(i0, in_size - 1)
    i1 = np.minimum(i0 + 1, in_size - 1)
    lam = src - i0
    w = np.zeros((out_size, in_size), dtype=np.float32)
    w[np.arange(out_size), i0] += (1.0 - lam).astype(np.float32)
    w[np.arange(out_size), i1] += lam.astype(np.float32)
    return w


def _ceil_to(x: int, m: int) -> int:
    return -(-x // m) * m


def _choose_tb(B: int, block_bytes_per_image: int,
               per_buffer_cap: int = 4 << 20, min_grid: int = 8) -> int:
    """Pick the batch tile TB (a divisor of B) such that:
      (a) the streamed image block stays <= ~4 MiB per buffer (roofline already
          saturates at 1-4 MiB tiles; keeps double-buffered in/out/tmp blocks
          comfortably inside every generation's VMEM, incl. v7x's 64 MiB),
      (b) the grid has >= min(min_grid, B) steps (>= 4 per v7x TensorCore so
          DMA-in / compute / DMA-out actually overlap),
      (c) the grid length is even when B >= 2 so both v7x TCs get equal work.
    Preferences are relaxed in that order if they cannot all be met."""
    divisors = [d for d in range(1, B + 1) if B % d == 0]

    def feasible(d):   # TB=1 always allowed even if a single image is large
        return d == 1 or d * block_bytes_per_image <= per_buffer_cap

    def grid_ok(d):
        return (B // d) >= min(min_grid, B)

    def even_ok(d):
        return B < 2 or (B // d) % 2 == 0

    for pred in ((lambda d: feasible(d) and grid_ok(d) and even_ok(d)),
                 (lambda d: feasible(d) and grid_ok(d)),
                 (lambda d: feasible(d) and even_ok(d)),
                 feasible):
        cands = [d for d in divisors if pred(d)]
        if cands:
            return max(cands)
    return 1


# ----------------------------------------------------------------------------
# Pallas kernel: wood noise synthesis + application, TB batch elements / step.
# ----------------------------------------------------------------------------
def _wood_kernel(tmp_ref, wwt_ref, base_ref, x_ref, o_ref, *,
                 sin_freq, normalising_constant):
    # tmp_ref : (TB, H, R)     height-interpolated noise (wh @ noise), per-batch block
    # wwt_ref : (R, W)         width bilinear weights (transposed), VMEM-resident
    # base_ref: (H, W)         batch-invariant sqrt(x^2+y^2) field, VMEM-resident
    # x_ref   : (TB, C*H, W)   images, channel-major rows (sublane-dense)
    # o_ref   : (TB, C*H, W)   adversarial images
    TB, H, R = tmp_ref.shape
    W = base_ref.shape[1]
    C = x_ref.shape[1] // H

    # Width-axis bilinear interpolation: one tiny MXU matmul (K = R = 8).
    # FLOPs are negligible on every generation — no K padding (per review).
    interp = jnp.dot(tmp_ref[...].reshape(TB * H, R), wwt_ref[...],
                     preferred_element_type=jnp.float32)          # (TB*H, W)

    # Tile-aligned second-minor split (H % 8 == 0 for typical sizes) — cheap.
    # All transcendental texture work runs on the sublane-dense (TB, H, W) shape.
    dist = interp.reshape(TB, H, W) + base_ref[...]               # (H,W) broadcasts over TB

    s = jnp.abs(jnp.sin(sin_freq * dist))
    nc = float(normalising_constant)
    if nc == 1.0:
        tex = s
    elif nc == 2.0:
        tex = jnp.sqrt(s)             # default case: avoid pow = exp(y*log(x))
    elif nc == 4.0:
        tex = jnp.sqrt(jnp.sqrt(s))
    else:
        tex = jnp.power(s, 1.0 / nc)

    # bf16 images: multiply/clamp in bf16 (packed VPU on v6e/v7x halves vector
    # work; on v5e the compiler up-converts, matching the f32 path anyway).
    if o_ref.dtype == jnp.bfloat16:
        tex = tex.astype(jnp.bfloat16)

    # Broadcast the texture over channels with C static, tile-aligned
    # slice-multiplies on (TB, H, W) views — dense sublanes, no materialised
    # (TB, C*H, W) texture copy, no relayout of the image block.
    for c in range(C):
        rows = slice(c * H, (c + 1) * H)
        adv = jnp.clip(x_ref[:, rows, :] * tex, 0.0, 1.0)   # clamp kept: module semantics
        o_ref[:, rows, :] = adv.astype(o_ref.dtype)


def wood_attack_apply(inputs, noise_variables, num_rings, normalising_constant):
    """inputs: (B, C, H, W) in [0,1]; noise_variables: (B, 1, R, R) f32.
    Returns adv_inputs = clamp(inputs * wood_noise(noise_variables), 0, 1)."""
    B, C, H, W = inputs.shape
    R = noise_variables.shape[-1]

    wh = jnp.asarray(_bilinear_matrix(H, R))                      # (H, R)
    wwt = jnp.asarray(_bilinear_matrix(W, R).T)                   # (R, W)

    # Hoist the tiny height-axis matmul out of the kernel: (B, H, R), negligible HBM.
    tmp = jnp.einsum('hr,brc->bhc', wh,
                     noise_variables[:, 0].astype(jnp.float32))   # (B, H, R)

    # Batch-invariant concentric-ring base pattern, 2-D (H, W): sublane-dense,
    # small, VMEM-resident (matches torch.meshgrid(..., indexing='xy')).
    ys = jnp.arange(H, dtype=jnp.float32)[:, None]
    xs = jnp.arange(W, dtype=jnp.float32)[None, :]
    xv = 2.0 * (xs - W / 2.0) / W
    yv = 2.0 * (ys - H / 2.0) / H
    base = jnp.sqrt(xv * xv + yv * yv)                            # (H, W)

    # Sublane-dense image layout: (B, C*H, W) — free reshape, no HBM transpose.
    x_ch = inputs.reshape(B, C * H, W)

    # Padding-aware per-image block bytes (sublane pad to 8, lane pad to 128).
    itemsize = jnp.dtype(inputs.dtype).itemsize
    img_block_bytes = _ceil_to(C * H, 8) * _ceil_to(W, 128) * itemsize
    TB = _choose_tb(B, img_block_bytes)

    kernel = functools.partial(
        _wood_kernel,
        sin_freq=float(math.pi * num_rings),
        normalising_constant=float(normalising_constant),
    )

    out = pl.pallas_call(
        kernel,
        out_shape=jax.ShapeDtypeStruct((B, C * H, W), inputs.dtype),
        grid_spec=pltpu.PrefetchScalarGridSpec(
            num_scalar_prefetch=0,
            grid=(B // TB,),
            in_specs=[
                # per-batch-tile height-interpolated noise
                pl.BlockSpec((TB, H, R), lambda b: (b, 0, 0)),
                # width interpolation matrix: same tile every step (resident)
                pl.BlockSpec((R, W), lambda b: (0, 0)),
                # batch-invariant base distance field: resident in VMEM
                pl.BlockSpec((H, W), lambda b: (0, 0)),
                # per-batch-tile images, sublane-dense rows (C*H)
                pl.BlockSpec((TB, C * H, W), lambda b: (b, 0, 0)),
            ],
            out_specs=pl.BlockSpec((TB, C * H, W), lambda b: (b, 0, 0)),
        ),
        compiler_params=pltpu.CompilerParams(
            dimension_semantics=("parallel",),
            # blocks are capped at ~4 MiB/buffer, so 48 MiB is ample headroom on
            # every generation (v7x 64 MiB VMEM; v5e's 16 MiB default is too low).
            vmem_limit_bytes=48 * 1024 * 1024,
        ),
    )(tmp, wwt, base, x_ch)

    return out.reshape(B, C, H, W)


# ----------------------------------------------------------------------------
# Pure-JAX reference (same math, no Pallas) for a sanity check.
# ----------------------------------------------------------------------------
def _reference(inputs, noise_variables, num_rings, normalising_constant):
    B, C, H, W = inputs.shape
    R = noise_variables.shape[-1]
    wh = jnp.asarray(_bilinear_matrix(H, R))
    ww = jnp.asarray(_bilinear_matrix(W, R))
    interp = jnp.einsum('hr,brc,wc->bhw', wh, noise_variables[:, 0], ww)
    ys = jnp.arange(H, dtype=jnp.float32)[:, None]
    xs = jnp.arange(W, dtype=jnp.float32)[None, :]
    xv = 2.0 * (xs - W / 2.0) / W
    yv = 2.0 * (ys - H / 2.0) / H
    dist = jnp.sqrt(xv * xv + yv * yv)[None] + interp
    tex = jnp.abs(jnp.sin(math.pi * num_rings * dist)) ** (1.0 / normalising_constant)
    return jnp.clip(inputs * tex[:, None], 0.0, 1.0)


if __name__ == "__main__":
    # Module hyper-parameters (forward-pass relevant ones).
    epsilon = 8.0 / 255.0
    noise_resolution = 8
    num_rings = 5
    normalising_constant = 2.0

    # Small deterministic inputs consistent with the module's shapes.
    B, C, H, W = 2, 4, 16, 16
    key = jax.random.PRNGKey(0)
    k_img, k_noise = jax.random.split(key)
    inputs = jax.random.uniform(k_img, (B, C, H, W), dtype=jnp.float32)
    # random_init=True branch: noise_variables = epsilon * U[0,1)
    noise_variables = epsilon * jax.random.uniform(
        k_noise, (B, 1, noise_resolution, noise_resolution), dtype=jnp.float32)

    adv = wood_attack_apply(inputs, noise_variables, num_rings, normalising_constant)
    adv = jax.block_until_ready(adv)

    ref = _reference(inputs, noise_variables, num_rings, normalising_constant)
    np_adv = np.asarray(adv)
    np_ref = np.asarray(ref)
    assert np_adv.shape == (B, C, H, W)
    assert np.allclose(np_adv, np_ref, rtol=1e-2, atol=1e-2), \
        f"max abs err {np.max(np.abs(np_adv - np_ref))}"

    print("KERNEL_OK")
</pallas_src>

<mosaic_0001>
module attributes {stable_mosaic.version = 11 : i64} {
  func.func @_wood_kernel(%arg0: i32, %arg1: memref<1x16x8xf32, #tpu.memory_space<vmem>>, %arg2: memref<8x16xf32, #tpu.memory_space<vmem>>, %arg3: memref<16x16xf32, #tpu.memory_space<vmem>>, %arg4: memref<1x64x16xf32, #tpu.memory_space<vmem>>, %arg5: memref<1x64x16xf32, #tpu.memory_space<vmem>>) attributes {dimension_semantics = [#tpu.dimension_semantics<parallel>], iteration_bounds = array<i64: 2>, scalar_prefetch = 0 : i64, scratch_operands = 0 : i64, tpu.core_type = #tpu.core_type<tc>, window_params = [{transform_indices = @transform_0, window_bounds = array<i64: 1, 16, 8>}, {pipeline_mode = #tpu.pipeline_mode<synchronous>, transform_indices = @transform_1, window_bounds = array<i64: 8, 16>}, {pipeline_mode = #tpu.pipeline_mode<synchronous>, transform_indices = @transform_2, window_bounds = array<i64: 16, 16>}, {transform_indices = @transform_3, window_bounds = array<i64: 1, 64, 16>}, {transform_indices = @transform_4, window_bounds = array<i64: 1, 64, 16>}]} {
    %c0 = arith.constant 0 : index
    %c0_0 = arith.constant 0 : index
    %c0_1 = arith.constant 0 : index
    %0 = vector.load %arg1[%c0, %c0_0, %c0_1] : memref<1x16x8xf32, #tpu.memory_space<vmem>>, vector<1x16x8xf32>
    %1 = vector.shape_cast %0 : vector<1x16x8xf32> to vector<16x8xf32>
    %c0_2 = arith.constant 0 : index
    %c0_3 = arith.constant 0 : index
    %2 = vector.load %arg2[%c0_2, %c0_3] : memref<8x16xf32, #tpu.memory_space<vmem>>, vector<8x16xf32>
    %cst = arith.constant dense<0.000000e+00> : vector<16x16xf32>
    %3 = tpu.matmul %1, %2, %cst {dimension_numbers = #tpu.dot_dimension_numbers<[1], [0], [0], [1], [0, 0, 1, 1], [], []>} : vector<16x8xf32>, vector<8x16xf32>, vector<16x16xf32> -> vector<16x16xf32>
    %4 = vector.shape_cast %3 : vector<16x16xf32> to vector<1x16x16xf32>
    %c0_4 = arith.constant 0 : index
    %c0_5 = arith.constant 0 : index
    %5 = vector.load %arg3[%c0_4, %c0_5] : memref<16x16xf32, #tpu.memory_space<vmem>>, vector<16x16xf32>
    %6 = vector.shape_cast %5 : vector<16x16xf32> to vector<1x16x16xf32>
    %7 = arith.addf %4, %6 : vector<1x16x16xf32>
    %cst_6 = arith.constant 15.707963 : f32
    %8 = vector.broadcast %cst_6 : f32 to vector<1x16x16xf32>
    %9 = arith.mulf %8, %7 : vector<1x16x16xf32>
    %10 = math.sin %9 : vector<1x16x16xf32>
    %11 = math.absf %10 : vector<1x16x16xf32>
    %12 = math.sqrt %11 : vector<1x16x16xf32>
    %c0_7 = arith.constant 0 : index
    %c0_8 = arith.constant 0 : index
    %c0_9 = arith.constant 0 : index
    %13 = vector.load %arg4[%c0_7, %c0_8, %c0_9] : memref<1x64x16xf32, #tpu.memory_space<vmem>>, vector<1x16x16xf32>
    %14 = arith.mulf %13, %12 : vector<1x16x16xf32>
    %cst_10 = arith.constant 0.000000e+00 : f32
    %cst_11 = arith.constant 1.000000e+00 : f32
    %15 = vector.broadcast %cst_10 : f32 to vector<1x16x16xf32>
    %16 = arith.maximumf %15, %14 : vector<1x16x16xf32>
    %17 = vector.broadcast %cst_11 : f32 to vector<1x16x16xf32>
    %18 = arith.minimumf %17, %16 : vector<1x16x16xf32>
    %c0_12 = arith.constant 0 : index
    %c0_13 = arith.constant 0 : index
    %c0_14 = arith.constant 0 : index
    %19 = vector.load %arg5[%c0_12, %c0_13, %c0_14] : memref<1x64x16xf32, #tpu.memory_space<vmem>>, vector<1x16x16xf32>
    tpu.vector_store %arg5[%c0_12, %c0_13, %c0_14], %18 {strides = array<i32>} : memref<1x64x16xf32, #tpu.memory_space<vmem>>, vector<1x16x16xf32>,
    %c0_15 = arith.constant 0 : index
    %c16 = arith.constant 16 : index
    %c0_16 = arith.constant 0 : index
    %20 = vector.load %arg4[%c0_15, %c16, %c0_16] : memref<1x64x16xf32, #tpu.memory_space<vmem>>, vector<1x16x16xf32>
    %21 = arith.mulf %20, %12 : vector<1x16x16xf32>
    %cst_17 = arith.constant 0.000000e+00 : f32
    %cst_18 = arith.constant 1.000000e+00 : f32
    %22 = vector.broadcast %cst_17 : f32 to vector<1x16x16xf32>
    %23 = arith.maximumf %22, %21 : vector<1x16x16xf32>
    %24 = vector.broadcast %cst_18 : f32 to vector<1x16x16xf32>
    %25 = arith.minimumf %24, %23 : vector<1x16x16xf32>
    %c0_19 = arith.constant 0 : index
    %c16_20 = arith.constant 16 : index
    %c0_21 = arith.constant 0 : index
    %26 = vector.load %arg5[%c0_19, %c16_20, %c0_21] : memref<1x64x16xf32, #tpu.memory_space<vmem>>, vector<1x16x16xf32>
    tpu.vector_store %arg5[%c0_19, %c16_20, %c0_21], %25 {strides = array<i32>} : memref<1x64x16xf32, #tpu.memory_space<vmem>>, vector<1x16x16xf32>,
    %c0_22 = arith.constant 0 : index
    %c32 = arith.constant 32 : index
    %c0_23 = arith.constant 0 : index
    %27 = vector.load %arg4[%c0_22, %c32, %c0_23] : memref<1x64x16xf32, #tpu.memory_space<vmem>>, vector<1x16x16xf32>
    %28 = arith.mulf %27, %12 : vector<1x16x16xf32>
    %cst_24 = arith.constant 0.000000e+00 : f32
    %cst_25 = arith.constant 1.000000e+00 : f32
    %29 = vector.broadcast %cst_24 : f32 to vector<1x16x16xf32>
    %30 = arith.maximumf %29, %28 : vector<1x16x16xf32>
    %31 = vector.broadcast %cst_25 : f32 to vector<1x16x16xf32>
    %32 = arith.minimumf %31, %30 : vector<1x16x16xf32>
    %c0_26 = arith.constant 0 : index
    %c32_27 = arith.constant 32 : index
    %c0_28 = arith.constant 0 : index
    %33 = vector.load %arg5[%c0_26, %c32_27, %c0_28] : memref<1x64x16xf32, #tpu.memory_space<vmem>>, vector<1x16x16xf32>
    tpu.vector_store %arg5[%c0_26, %c32_27, %c0_28], %32 {strides = array<i32>} : memref<1x64x16xf32, #tpu.memory_space<vmem>>, vector<1x16x16xf32>,
    %c0_29 = arith.constant 0 : index
    %c48 = arith.constant 48 : index
    %c0_30 = arith.constant 0 : index
    %34 = vector.load %arg4[%c0_29, %c48, %c0_30] : memref<1x64x16xf32, #tpu.memory_space<vmem>>, vector<1x16x16xf32>
    %35 = arith.mulf %34, %12 : vector<1x16x16xf32>
    %cst_31 = arith.constant 0.000000e+00 : f32
    %cst_32 = arith.constant 1.000000e+00 : f32
    %36 = vector.broadcast %cst_31 : f32 to vector<1x16x16xf32>
    %37 = arith.maximumf %36, %35 : vector<1x16x16xf32>
    %38 = vector.broadcast %cst_32 : f32 to vector<1x16x16xf32>
    %39 = arith.minimumf %38, %37 : vector<1x16x16xf32>
    %c0_33 = arith.constant 0 : index
    %c48_34 = arith.constant 48 : index
    %c0_35 = arith.constant 0 : index
    %40 = vector.load %arg5[%c0_33, %c48_34, %c0_35] : memref<1x64x16xf32, #tpu.memory_space<vmem>>, vector<1x16x16xf32>
    tpu.vector_store %arg5[%c0_33, %c48_34, %c0_35], %39 {strides = array<i32>} : memref<1x64x16xf32, #tpu.memory_space<vmem>>, vector<1x16x16xf32>,
    return
  }
  func.func @transform_0(%arg0: i32) -> (i32, i32, i32) {
    %c0_i32 = arith.constant 0 : i32
    %c0_i32_0 = arith.constant 0 : i32
    %c0_i32_1 = arith.constant 0 : i32
    return %arg0, %c0_i32, %c0_i32_0 : i32, i32, i32
  }
  func.func @transform_1(%arg0: i32) -> (i32, i32) {
    %c0_i32 = arith.constant 0 : i32
    %c0_i32_0 = arith.constant 0 : i32
    %c0_i32_1 = arith.constant 0 : i32
    return %c0_i32, %c0_i32_0 : i32, i32
  }
  func.func @transform_2(%arg0: i32) -> (i32, i32) {
    %c0_i32 = arith.constant 0 : i32
    %c0_i32_0 = arith.constant 0 : i32
    %c0_i32_1 = arith.constant 0 : i32
    return %c0_i32, %c0_i32_0 : i32, i32
  }
  func.func @transform_3(%arg0: i32) -> (i32, i32, i32) {
    %c0_i32 = arith.constant 0 : i32
    %c0_i32_0 = arith.constant 0 : i32
    %c0_i32_1 = arith.constant 0 : i32
    return %arg0, %c0_i32, %c0_i32_0 : i32, i32, i32
  }
  func.func @transform_4(%arg0: i32) -> (i32, i32, i32) {
    %c0_i32 = arith.constant 0 : i32
    %c0_i32_0 = arith.constant 0 : i32
    %c0_i32_1 = arith.constant 0 : i32
    return %arg0, %c0_i32, %c0_i32_0 : i32, i32, i32
  }
}

</mosaic_0001>

<bundles_post_ra>
// kernel: tpu_custom_call.1
= control target key start
LH: loop header
LB: loop body
LE: loop exit
PB: predicated region body
PF: predicated region fallthrough
CT: control target
= control target key end

     0   :  { %s785_s15 = smov 0   ;;  %s1032_s0 = inlined_call_operand.vmem [shape: f32[2,16,8], index: 0, kind: input, shape index: {}]   ;;  %s1033_s1 = inlined_call_operand.vmem [shape: f32[8,16], index: 1, kind: input, shape index: {}]   ;;  %s1034_s2 = inlined_call_operand.vmem [shape: f32[16,16], index: 2, kind: input, shape index: {}]   ;;  %s1035_s3 = inlined_call_operand.vmem [shape: f32[2,64,16], index: 3, kind: input, shape index: {}]   ;;  %s1036_s4 = inlined_call_operand.vmem [shape: f32[2,64,16], index: 4, kind: output, shape index: {}]  }
   0x1 LB: > { %s701_s16 = sadd.s32 4294967295, %s751_s15   ;;  %p705_p0 = scmp.ge.s32.totalorder %s751_s15, 1  ;;  %s751_s15 = sphi %s785_s15, %s14_s15  }
   0x2   : > { %p172_p1 = scmp.lt.s32.totalorder %s751_s15, 3 }
   0x4   : > { %p173_p2 = pnand %p705_p0, %p172_p1 }
   0x5   : > { %p203_p3 = scmp.lt.s32.totalorder (!%p173_p2), %s701_s16, 1 }
   0x6   : > { %176 = sbr.rel (%p173_p2) target bundleno = 292 (0x124), region = 36 }
   0xb   : > { %v220_v0 = vld [vmem:[%s1033_s1] sm:$0xff]  ;;  %s1042_s16 = smov (!%p203_p3, %s701_s16), 1  ;;  %vm221_vm0 = vcmask 64512   ;;  %v252_v4 = vld [vmem:[%s1034_s2 + $0x8] sm:$0xff]  ;;  %v753_v34 = vmov 683565275  }
   0xc   : > { %243 = vmatpush.msra.mxu0 %v220_v0  ;;  %725 = vmatpush.msra.mxu1 %v220_v0  ;;  %s722_s19 = sshll.u32 %s1042_s16, 4  ;;  %v251_v3 = vld [vmem:[%s1034_s2] sm:$0xff]  ;;  %v754_v36 = vmov 2475754826   ;;  %v755_v40 = vmov 2131351028  }
   0xd   : > { %s207_s22 = scalar_lea.vmem %s1032_s0, %s722_s19  ;;  %v756_v43 = vmov 2102212464   ;;  %v757_v46 = vmov 920167782   ;;  %v758_v49 = vmov 1326507024  }
   0xe   : > { %v218_v1 = vld [vmem:[%s207_s22] sm:$0xff]  ;;  %v219_v2 = vld [vmem:[%s207_s22 + $0x8] sm:$0xff]  ;;  %s723_s27 = sshll.u32 %s1042_s16, 6 }
   0xf   : > { %712 = vmatmul.msk.f32.vlgmr.msra.gmra.mxu0 %vm221_vm0, %v218_v1  ;;  %713 = vmatmul.msk.f32.vlgmr.msra.gmra.mxu1 %vm221_vm0, %v219_v2  ;;  %s995_s30 = scalar_lea.vmem %s1035_s3, %s723_s27  ;;  %s1007_s7 = scalar_lea.vmem %s1036_s4, %s723_s27 }
  0x8c   : > { %v245_v5 = vpop.f32.mrf.mxu0  ;;  %v248_v6 = vpop.f32.mrf.mxu1 }
  0x8d   : > { %v253_v7 = vadd.f32 %v251_v3, %v245_v5  ;;  %v254_v8 = vadd.f32 %v252_v4, %v248_v6 }
  0x8f   : > { %v808_v9 = vmul.f32 15.707963, %v253_v7  ;;  %v810_v10 = vmul.f32 15.707963, %v254_v8 }
  0x91   : > { %v257_v11 = vand.u32 2147483647, %v808_v9  ;;  %v260_v12 = vand.u32 2139095040, %v808_v9  ;;  %v412_v13 = vand.u32 2147483647, %v810_v10  ;;  %v415_v14 = vand.u32 2139095040, %v810_v10 }
  0x93   : > { %v261_v15 = vshrl.u32 %v260_v12, 23  ;;  %v264_v16 = vand.u32 8388607, %v257_v11  ;;  %v416_v17 = vshrl.u32 %v415_v14, 23  ;;  %v419_v20 = vand.u32 8388607, %v412_v13 }
  0x95   : > { %v714_v18 = vadd.s32 4294967169, %v261_v15  ;;  %v265_v19 = vor.u32 8388608, %v264_v16  ;;  %v717_v21 = vadd.s32 4294967169, %v416_v17  ;;  %v420_v25 = vor.u32 8388608, %v419_v20 }
  0x97   : > { %v267_v22 = vadd.s32 1, %v714_v18  ;;  %v422_v23 = vadd.s32 1, %v717_v21  ;;  %v820_v24 = vshll.u32 %v265_v19, 8  ;;  %v827_v32 = vshll.u32 %v420_v25, 8 }
  0x99   : > { %vm268_vm1 = vcmp.gt.s32.totalorder %v267_v22, 0  ;;  %vm423_vm2 = vcmp.gt.s32.totalorder %v422_v23, 0  ;;  %v823_v30 = vand.u32 65535, %v820_v24  ;;  %v307_v38 = vshrl.u32 %v820_v24, 16 }
  0x9a   : > { %v269_v26 = vsel %vm268_vm1, %v267_v22, 0  ;;  %v424_v28 = vsel %vm423_vm2, %v422_v23, 0 }
  0x9b   : > { %v271_v27 = vand.u32 31, %v269_v26  ;;  %v825_v31 = vand.u32 31, %v424_v28  ;;  %v829_v33 = vshrl.u32 %v269_v26, 5  ;;  %v867_v17 = vshrl.u32 %v424_v28, 5 }
  0x9d   : > { %v272_v29 = vsub.s32 32, %v271_v27  ;;  %v274_v35 = vshll.u32 %v753_v34, %v271_v27  ;;  %v277_v37 = vshll.u32 %v754_v36, %v271_v27  ;;  %v280_v42 = vshll.u32 %v755_v40, %v271_v27 }
  0x9e   : > { %v283_v45 = vshll.u32 %v756_v43, %v271_v27  ;;  %v286_v48 = vshll.u32 %v757_v46, %v271_v27  ;;  %v839_v54 = vsub.s32 32, %v825_v31  ;;  %vm289_vm3 = vcmp.lt.s32.totalorder %v829_v33, 1 }
  0x9f   : > { %v275_v39 = vshrl.u32 %v754_v36, %v272_v29  ;;  %v278_v41 = vshrl.u32 %v755_v40, %v272_v29  ;;  %v281_v44 = vshrl.u32 %v756_v43, %v272_v29  ;;  %v284_v47 = vshrl.u32 %v757_v46, %v272_v29 }
  0xa0   : > { %v287_v50 = vshrl.u32 %v758_v49, %v272_v29  ;;  %vm290_vm4 = vcmp.lt.s32.totalorder %v829_v33, 2  ;;  %v273_v57 = vshrl.u32 %v753_v34, %v272_v29  ;;  %vm292_vm5 = vcmp.lt.s32.totalorder %v829_v33, 4 }
  0xa1   : > { %v276_v51 = vor.u32 %v275_v39, %v274_v35  ;;  %v279_v52 = vor.u32 %v278_v41, %v277_v37  ;;  %v282_v53 = vor.u32 %v281_v44, %v280_v42  ;;  %v285_v55 = vor.u32 %v284_v47, %v283_v45 }
  0xa2   : > { %v288_v56 = vor.u32 %v287_v50, %v286_v48  ;;  %vm291_vm6 = vcmp.lt.s32.totalorder %v829_v33, 3  ;;  %v429_v62 = vshll.u32 %v753_v34, %v825_v31  ;;  %v430_v2 = vshrl.u32 %v754_v36, %v839_v54 }
  0xa3   : > { %v297_v58 = vsel %vm289_vm3, %v276_v51, %v279_v52  ;;  %v301_v59 = vsel %vm289_vm3, %v279_v52, %v282_v53  ;;  %v298_v60 = vsel %vm292_vm5, %v285_v55, 920167782  ;;  %v294_v63 = vsel %vm292_vm5, %v282_v53, 2102212464 }
  0xa4   : > { %v302_v61 = vsel %vm292_vm5, %v288_v56, 1326507024  ;;  %v299_v0 = vsel %vm291_vm6, %v282_v53, %v298_v60  ;;  %v432_v5 = vshll.u32 %v754_v36, %v825_v31  ;;  %v433_v6 = vshrl.u32 %v755_v40, %v839_v54 }
  0xa5   : > { %v303_v1 = vsel %vm291_vm6, %v285_v55, %v302_v61  ;;  %v300_v3 = vsel %vm290_vm4, %v297_v58, %v299_v0  ;;  %v293_v15 = vsel %vm289_vm3, %v273_v57, %v276_v51  ;;  %v295_v16 = vsel %vm291_vm6, %v279_v52, %v294_v63 }
  0xa6   : > { %v304_v4 = vsel %vm290_vm4, %v301_v59, %v303_v1  ;;  %v330_v12 = vand.u32 65535, %v300_v3  ;;  %v331_v14 = vshrl.u32 %v300_v3, 16  ;;  %v869_v18 = vor.u32 %v430_v2, %v429_v62 }
  0xa7   : > { %v308_v7 = vand.u32 65535, %v304_v4  ;;  %v309_v8 = vshrl.u32 %v304_v4, 16  ;;  %v872_v21 = vor.u32 %v433_v6, %v432_v5  ;;  %v436_v22 = vshrl.u32 %v756_v43, %v839_v54 }
  0xa8   : > { %v333_v25 = vmul.u32 %v331_v14, %v823_v30  ;;  %v334_v26 = vmul.u32 %v330_v12, %v307_v38  ;;  %v435_v27 = vshll.u32 %v755_v40, %v825_v31  ;;  %v332_v35 = vmul.u32 %v330_v12, %v823_v30 }
  0xa9   : > { %v311_v19 = vmul.u32 %v309_v8, %v823_v30  ;;  %v312_v20 = vmul.u32 %v308_v7, %v307_v38  ;;  %v310_v23 = vmul.u32 %v308_v7, %v823_v30  ;;  %v313_v29 = vmul.u32 %v309_v8, %v307_v38 }
  0xaa   : > { %v335_v36 = vmul.u32 %v331_v14, %v307_v38  ;;  %v336_v42 = vshll.u32 %v333_v25, 16  ;;  %v338_v45 = vshll.u32 %v334_v26, 16  ;;  %v880_v47 = vor.u32 %v436_v22, %v435_v27 }
  0xab   : > { %v314_v28 = vshll.u32 %v311_v19, 16  ;;  %v315_v37 = vshrl.u32 %v311_v19, 16  ;;  %v316_v39 = vshll.u32 %v312_v20, 16  ;;  %v317_v41 = vshrl.u32 %v312_v20, 16 }
  0xac   : > { %v759_v48 = vmov 0   ;;  %vm340_vm8 = vc.u32 %v332_v35, %v336_v42  ;;  %v342_v51 = vadd.s32 %v336_v42, %v332_v35  ;;  %v439_v40 = vshrl.u32 %v757_v46, %v839_v54 }
  0xad   : > { %vm318_vm7 = vc.u32 %v310_v23, %v314_v28  ;;  %v320_v44 = vadd.s32 %v314_v28, %v310_v23  ;;  %v341_v30 = vsel %vm340_vm8, 1, %v759_v48  ;;  %v438_v38 = vshll.u32 %v756_v43, %v825_v31 }
  0xae   : > { %v319_v50 = vsel %vm318_vm7, 1, %v759_v48  ;;  %v343_v55 = vadd.s32 %v341_v30, %v335_v36  ;;  %vm344_vm10 = vc.u32 %v342_v51, %v338_v45  ;;  %v441_v56 = vshll.u32 %v757_v46, %v825_v31 }
  0xaf   : > { %v321_v52 = vadd.s32 %v319_v50, %v313_v29  ;;  %vm322_vm9 = vc.u32 %v320_v44, %v316_v39  ;;  %v345_v58 = vsel %vm344_vm10, 1, %v759_v48  ;;  %v440_v59 = vor.u32 %v439_v40, %v438_v38 }
  0xb0   : > { %v323_v53 = vsel %vm322_vm9, 1, %v759_v48  ;;  %v442_v60 = vshrl.u32 %v758_v49, %v839_v54  ;;  %v337_v61 = vshrl.u32 %v333_v25, 16  ;;  %v339_v62 = vshrl.u32 %v334_v26, 16 }
  0xb1   : > { %v325_v57 = vadd.s32 %v323_v53, %v321_v52  ;;  %v894_v63 = vadd.s32 %v342_v51, %v338_v45  ;;  %v347_v0 = vadd.s32 %v345_v58, %v343_v55  ;;  %vm444_vm11 = vcmp.lt.s32.totalorder %v867_v17, 1 }
  0xb2   : > { %v443_v1 = vor.u32 %v442_v60, %v441_v56  ;;  %vm447_vm12 = vcmp.lt.s32.totalorder %v867_v17, 4  ;;  %vm446_vm13 = vcmp.lt.s32.totalorder %v867_v17, 3  ;;  %v452_v31 = vsel %vm444_vm11, %v869_v18, %v872_v21 }
  0xb3   : > { %v326_v43 = vadd.s32 %v325_v57, %v315_v37  ;;  %v348_v2 = vadd.s32 %v347_v0, %v337_v61  ;;  %v453_v46 = vsel %vm447_vm12, %v440_v59, 920167782  ;;  %vm445_vm14 = vcmp.lt.s32.totalorder %v867_v17, 2 }
  0xb4   : > { %v454_v3 = vsel %vm446_vm13, %v880_v47, %v453_v46  ;;  %v456_v4 = vsel %vm444_vm11, %v872_v21, %v880_v47  ;;  %v296_v5 = vsel %vm290_vm4, %v293_v15, %v295_v16  ;;  %v457_v8 = vsel %vm447_vm12, %v443_v1, 1326507024 }
  0xb5   : > { %v905_v49 = vadd.s32 %v326_v43, %v317_v41  ;;  %v349_v6 = vadd.s32 %v348_v2, %v339_v62  ;;  %v455_v7 = vsel %vm445_vm14, %v452_v31, %v454_v3  ;;  %v458_v12 = vsel %vm446_vm13, %v440_v59, %v457_v8 }
  0xb6   : > { %v461_v14 = vand.u32 65535, %v827_v32  ;;  %v485_v19 = vand.u32 65535, %v455_v7  ;;  %v459_v33 = vsel %vm445_vm14, %v456_v4, %v458_v12  ;;  %v462_v15 = vshrl.u32 %v827_v32, 16 }
  0xb7   : > { %vm352_vm15 = vc.u32 %v905_v49, %v894_v63  ;;  %v353_v20 = vadd.s32 1, %v349_v6  ;;  %v486_v16 = vshrl.u32 %v455_v7, 16  ;;  %v350_v22 = vmul.u32 %v820_v24, %v296_v5 }
  0xb8   : > { %v463_v23 = vand.u32 65535, %v459_v33  ;;  %v464_v25 = vshrl.u32 %v459_v33, 16  ;;  %v489_v29 = vmul.u32 %v485_v19, %v462_v15  ;;  %v487_v37 = vmul.u32 %v485_v19, %v461_v14 }
  0xb9   : > { %v354_v26 = vsel %vm352_vm15, %v353_v20, %v349_v6  ;;  %v488_v27 = vmul.u32 %v486_v16, %v461_v14  ;;  %v490_v39 = vmul.u32 %v486_v16, %v462_v15  ;;  %v449_v57 = vsel %vm447_vm12, %v880_v47, 2102212464 }
  0xba   : > { %v355_v28 = vadd.s32 %v354_v26, %v350_v22  ;;  %v466_v35 = vmul.u32 %v464_v25, %v461_v14  ;;  %v467_v36 = vmul.u32 %v463_v23, %v462_v15  ;;  %v465_v44 = vmul.u32 %v463_v23, %v461_v14 }
  0xbb   : > { %v491_v41 = vshll.u32 %v488_v27, 16  ;;  %v468_v45 = vmul.u32 %v464_v25, %v462_v15  ;;  %v493_v40 = vshll.u32 %v489_v29, 16  ;;  %v428_v59 = vshrl.u32 %v753_v34, %v839_v54 }
  0xbc   : > { %v356_v42 = vadd.s32 536870912, %v355_v28  ;;  %v469_v50 = vshll.u32 %v466_v35, 16  ;;  %v471_v51 = vshll.u32 %v467_v36, 16  ;;  %v470_v0 = vshrl.u32 %v466_v35, 16 }
  0xbd   : > { %vm495_vm0 = vc.u32 %v487_v37, %v491_v41  ;;  %v497_v52 = vadd.s32 %v491_v41, %v487_v37  ;;  %v448_v2 = vsel %vm444_vm11, %v428_v59, %v869_v18  ;;  %v450_v47 = vsel %vm446_vm13, %v872_v21, %v449_v57 }
  0xbe   : > { %v930_v24 = vshrl.u32 %v356_v42, 30  ;;  %vm473_vm1 = vc.u32 %v465_v44, %v469_v50  ;;  %v475_v30 = vadd.s32 %v469_v50, %v465_v44  ;;  %v496_v38 = vsel %vm495_vm0, 1, %v759_v48 }
  0xbf   : > { %v474_v53 = vsel %vm473_vm1, 1, %v759_v48  ;;  %v498_v55 = vadd.s32 %v496_v38, %v490_v39  ;;  %vm499_vm2 = vc.u32 %v497_v52, %v493_v40  ;;  %v492_v31 = vshrl.u32 %v488_v27, 16 }
  0xc0   : > { %v358_v56 = vshll.u32 %v930_v24, 30  ;;  %v476_v58 = vadd.s32 %v474_v53, %v468_v45  ;;  %vm477_vm3 = vc.u32 %v475_v30, %v471_v51  ;;  %v500_v61 = vsel %vm499_vm2, 1, %v759_v48 }
  0xc1   : > { %v478_v60 = vsel %vm477_vm3, 1, %v759_v48  ;;  %v502_v1 = vadd.s32 %v500_v61, %v498_v55  ;;  %v472_v34 = vshrl.u32 %v467_v36, 16  ;;  %v494_v3 = vshrl.u32 %v489_v29, 16 }
  0xc2   : > { %v359_v62 = vsub.s32 %v355_v28, %v358_v56  ;;  %v480_v43 = vadd.s32 %v478_v60, %v476_v58  ;;  %v451_v7 = vsel %vm445_vm14, %v448_v2, %v450_v47  ;;  %v501_v8 = vadd.s32 %v497_v52, %v493_v40 }
  0xc3   : > { %v503_v4 = vadd.s32 %v502_v1, %v492_v31  ;;  %v505_v21 = vmul.u32 %v827_v32, %v451_v7  ;;  %v351_v15 = vadd.s32 %v894_v63, %v905_v49  ;;  %vm259_vm8 = vcmp.lt.s32.totalorder %v808_v9, 0 }
  0xc4   : > { %vm360_vm4 = vcmp.lt.s32.totalorder %v359_v62, 0  ;;  %v361_v46 = vsub.s32 0, %v359_v62  ;;  %v481_v54 = vadd.s32 %v480_v43, %v470_v0  ;;  %vm959_vm9 = vcmp.le.f32.partialorder %v257_v11, 0.7853982 }
  0xc5   : > { %v504_v12 = vadd.s32 %v503_v4, %v494_v3  ;;  %v381_v40 = vsub.s32 4, %v930_v24  ;;  %vm972_vm11 = vcmp.le.f32.partialorder %v412_v13, 0.7853982  ;;  %vm414_vm12 = vcmp.lt.s32.totalorder %v810_v10, 0 }
  0xc6   : > { %v362_v48 = vsel %vm360_vm4, %v361_v46, %v359_v62  ;;  %v482_v5 = vadd.s32 %v481_v54, %v472_v34  ;;  %vm400_vm0 = vweird.f32 %v808_v9  ;;  %vm555_vm4 = vweird.f32 %v810_v10 }
  0xc7   : > { %v363_v6 = vclz %v362_v48  ;;  %v508_v14 = vadd.s32 1, %v504_v12  ;;  %v382_v11 = vsel %vm259_vm8, %v381_v40, %v930_v24 }
  0xc8   : > { %vm507_vm5 = vc.u32 %v482_v5, %v501_v8  ;;  %v506_v56 = vadd.s32 %v501_v8, %v482_v5  ;;  %v384_v43 = vsel %vm959_vm9, 0, %v382_v11 }
  0xc9   : > { %v715_v18 = vadd.s32 4294967294, %v363_v6  ;;  %v509_v19 = vsel %vm507_vm5, %v508_v14, %v504_v12  ;;  %v401_v54 = vadd.s32 3, %v384_v43 }
  0xca   : > { %v510_v33 = vadd.s32 %v509_v19, %v505_v21 }
  0xcb   : > { %vm716_vm6 = vcmp.lt.s32.totalorder %v715_v18, 0  ;;  %v402_v8 = vand.u32 3, %v401_v54 }
  0xcc   : > { %v366_v20 = vsel %vm716_vm6, 0, %v715_v18  ;;  %v511_v23 = vadd.s32 536870912, %v510_v33 }
  0xcd   : > { %v367_v16 = vsub.s32 32, %v366_v20  ;;  %v371_v22 = vsub.s32 4294967266, %v366_v20  ;;  %v368_v25 = vshll.u32 %v359_v62, %v366_v20  ;;  %vm403_vm13 = vcmp.lt.s32.totalorder %v402_v8, 2 }
  0xce   : > { %v953_v27 = vshrl.u32 %v511_v23, 30  ;;  %vm404_vm14 = vcmp.eq.s32.totalorder %v402_v8, 0  ;;  %vm407_vm15 = vcmp.eq.s32.totalorder %v402_v8, 2 }
  0xcf   : > { %v369_v17 = vshrl.u32 %v351_v15, %v367_v16  ;;  %v372_v26 = vadd.s32 127, %v371_v22 }
  0xd0   : > { %v513_v35 = vshll.u32 %v953_v27, 30  ;;  %v536_v22 = vsub.s32 4, %v953_v27 }
  0xd1   : > { %v370_v29 = vor.u32 %v369_v17, %v368_v25  ;;  %v373_v28 = vshll.u32 %v372_v26, 23 }
  0xd2   : > { %v514_v36 = vsub.s32 %v510_v33, %v513_v35  ;;  %v537_v35 = vsel %vm414_vm12, %v536_v22, %v953_v27 }
  0xd3   : > { %v374_v32 = vor.u32 4788187, %v373_v28  ;;  %v377_v39 = vcvt.s32.f32 %v370_v29 }
  0xd4   : > { %vm515_vm7 = vcmp.lt.s32.totalorder %v514_v36, 0  ;;  %v516_v41 = vsub.s32 0, %v514_v36 }
  0xd5   : > { %v375_v37 = vand.u32 2147483647, %v374_v32 }
  0xd6   : > { %v517_v63 = vsel %vm515_vm7, %v516_v41, %v514_v36  ;;  %vm601_vm7 = vcmask 130048  }
  0xd7   : > { %v378_v42 = vmul.f32 %v377_v39, %v375_v37  ;;  %v518_v44 = vclz %v517_v63  ;;  %v539_v37 = vsel %vm972_vm11, 0, %v537_v35 }
  0xd8   : > { %v556_v63 = vadd.s32 3, %v539_v37 }
  0xd9   : > { %v379_v49 = vxor.u32 2147483648, %v378_v42  ;;  %v718_v51 = vadd.s32 4294967294, %v518_v44 }
  0xda   : > { %v557_v27 = vand.u32 3, %v556_v63 }
  0xdb   : > { %v380_v50 = vsel %vm259_vm8, %v379_v49, %v378_v42  ;;  %vm719_vm10 = vcmp.lt.s32.totalorder %v718_v51, 0 }
  0xdc   : > { %v383_v52 = vsel %vm959_vm9, %v808_v9, %v380_v50  ;;  %v521_v38 = vsel %vm719_vm10, 0, %v718_v51  ;;  %vm559_vm1 = vcmp.eq.s32.totalorder %v557_v27, 0  ;;  %vm562_vm2 = vcmp.eq.s32.totalorder %v557_v27, 2 }
  0xdd   : > { %v385_v30 = vmul.f32 %v383_v52, %v383_v52  ;;  %v522_v57 = vsub.s32 32, %v521_v38  ;;  %v526_v58 = vsub.s32 4294967266, %v521_v38  ;;  %v523_v62 = vshll.u32 %v514_v36, %v521_v38 }
  0xde   : > { %vm558_vm3 = vcmp.lt.s32.totalorder %v557_v27, 2 }
  0xdf   : > { %v386_v53 = vmul.f32 -0.001358992, %v385_v30  ;;  %v393_v55 = vmul.f32 -0.00019511016, %v385_v30  ;;  %v524_v61 = vshrl.u32 %v506_v56, %v522_v57  ;;  %v527_v0 = vadd.s32 127, %v526_v58 }
  0xe1   : > { %v387_v59 = vadd.f32 0.041655596, %v386_v53  ;;  %v394_v60 = vadd.f32 0.008332121, %v393_v55  ;;  %v525_v47 = vor.u32 %v524_v61, %v523_v62  ;;  %v528_v31 = vshll.u32 %v527_v0, 23  ;;  %v593_v0 = vld [vmem:[%s995_s30] sm:$0xff] }
  0xe3   : > { %v388_v1 = vmul.f32 %v387_v59, %v385_v30  ;;  %v395_v2 = vmul.f32 %v394_v60, %v385_v30  ;;  %v529_v3 = vor.u32 4788187, %v528_v31  ;;  %v532_v5 = vcvt.s32.f32 %v525_v47  ;;  %v624_v47 = vld [vmem:[%s995_s30 + $0x30] sm:$0xff] }
  0xe5   : > { %v389_v46 = vadd.f32 -0.4999988, %v388_v1  ;;  %v396_v34 = vadd.f32 -0.16666654, %v395_v2  ;;  %v530_v24 = vand.u32 2147483647, %v529_v3 }
  0xe6   : > { %v604_v1 = vld [vmem:[%s995_s30 + $0x10] sm:$0xff]  ;;  %v614_v2 = vld [vmem:[%s995_s30 + $0x20] sm:$0xff] }
  0xe7   : > { %v390_v4 = vmul.f32 %v389_v46, %v385_v30  ;;  %v397_v48 = vmul.f32 %v396_v34, %v385_v30  ;;  %v533_v12 = vmul.f32 %v532_v5, %v530_v24 }
  0xe9   : > { %v391_v6 = vadd.f32 1.0, %v390_v4  ;;  %v398_v7 = vadd.f32 1.0, %v397_v48  ;;  %v534_v21 = vxor.u32 2147483648, %v533_v12 }
  0xeb   : > { %v399_v18 = vmul.f32 %v398_v7, %v383_v52  ;;  %v408_v14 = vxor.u32 2147483648, %v391_v6  ;;  %v535_v33 = vsel %vm414_vm12, %v534_v21, %v533_v12 }
  0xec   : > { %v538_v23 = vsel %vm972_vm11, %v810_v10, %v535_v33 }
  0xed   : > { %v405_v19 = vxor.u32 2147483648, %v399_v18  ;;  %v409_v16 = vsel %vm407_vm15, %v408_v14, %v399_v18  ;;  %v540_v25 = vmul.f32 %v538_v23, %v538_v23 }
  0xef   : > { %v406_v15 = vsel %vm404_vm14, %v391_v6, %v405_v19  ;;  %v541_v26 = vmul.f32 -0.001358992, %v540_v25  ;;  %v548_v29 = vmul.f32 -0.00019511016, %v540_v25 }
  0xf0   : > { %v410_v13 = vsel %vm403_vm13, %v406_v15, %v409_v16  ;;  %v594_v16 = vld [vmem:[%s995_s30 + $0x8] sm:$0xff] }
  0xf1   : > { %v411_v17 = vsel %vm400_vm0, nan, %v410_v13  ;;  %v542_v32 = vadd.f32 0.041655596, %v541_v26  ;;  %v549_v36 = vadd.f32 0.008332121, %v548_v29  ;;  %v615_v13 = vld [vmem:[%s995_s30 + $0x28] sm:$0xff] }
  0xf2   : > { %v567_v28 = vand.u32 2147483647, %v411_v17 }
  0xf3   : > { %v543_v39 = vmul.f32 %v542_v32, %v540_v25  ;;  %v550_v41 = vmul.f32 %v549_v36, %v540_v25 }
  0xf4   : > { %741 = vrsqrt.f32 %v567_v28  ;;  %vm576_vm5 = vcmp.eq.f32.partialorder %v567_v28, inf  ;;  %v579_v43 = vand.u32 2147483648, %v567_v28  ;;  %vm578_vm6 = vcmp.eq.f32.partialorder %v567_v28, 0.0 }
  0xf5   : > { %v544_v9 = vadd.f32 -0.4999988, %v543_v39  ;;  %v551_v42 = vadd.f32 -0.16666654, %v550_v41 }
  0xf7   : > { %v545_v44 = vmul.f32 %v544_v9, %v540_v25  ;;  %v552_v45 = vmul.f32 %v551_v42, %v540_v25  ;;  %v625_v25 = vld [vmem:[%s995_s30 + $0x38] sm:$0xff] }
  0xf9   : > { %v546_v51 = vadd.f32 1.0, %v545_v44  ;;  %v553_v40 = vadd.f32 1.0, %v552_v45 }
  0xfa   : > { %v742_v49 = vpop.eup %741 }
  0xfb   : > { %v570_v50 = vmul.f32 %v742_v49, %v567_v28  ;;  %v554_v30 = vmul.f32 %v553_v40, %v538_v23  ;;  %v563_v38 = vxor.u32 2147483648, %v546_v51  ;;  %v605_v23 = vld [vmem:[%s995_s30 + $0x18] sm:$0xff] }
  0xfd   : > { %v571_v52 = vmul.f32 %v742_v49, %v570_v50  ;;  %v560_v55 = vxor.u32 2147483648, %v554_v30  ;;  %v564_v11 = vsel %vm562_vm2, %v563_v38, %v554_v30 }
  0xff   : > { %v572_v53 = vmul.f32 0.5, %v571_v52  ;;  %v561_v57 = vsel %vm559_vm1, %v546_v51, %v560_v55 }
 0x100   : > { %v565_v58 = vsel %vm558_vm3, %v561_v57, %v564_v11 }
 0x101   : > { %v573_v56 = vsub.f32 1.5, %v572_v53  ;;  %v566_v60 = vsel %vm555_vm4, nan, %v565_v58 }
 0x102   : > { %v568_v61 = vand.u32 2147483647, %v566_v60 }
 0x103   : > { %v574_v59 = vmul.f32 %v742_v49, %v573_v56 }
 0x104   : > { %743 = vrsqrt.f32 %v568_v61  ;;  %vm588_vm8 = vcmp.eq.f32.partialorder %v568_v61, inf  ;;  %v591_v22 = vand.u32 2147483648, %v568_v61  ;;  %vm590_vm9 = vcmp.eq.f32.partialorder %v568_v61, 0.0 }
 0x105   : > { %v575_v62 = vmul.f32 %v574_v59, %v567_v28 }
 0x107   : > { %v577_v31 = vsel %vm576_vm5, %v567_v28, %v575_v62 }
 0x108   : > { %v580_v46 = vsel %vm578_vm6, %v579_v43, %v577_v31 }
 0x109   : > { %v595_v34 = vmul.f32 %v593_v0, %v580_v46  ;;  %v606_v54 = vmul.f32 %v604_v1, %v580_v46  ;;  %v616_v3 = vmul.f32 %v614_v2, %v580_v46  ;;  %v626_v10 = vmul.f32 %v624_v47, %v580_v46 }
 0x10a   : > { %v744_v6 = vpop.eup %743 }
 0x10b   : > { %v597_v4 = vmax.f32 %v595_v34, 0.0  ;;  %v608_v48 = vmax.f32 %v606_v54, 0.0  ;;  %v618_v24 = vmax.f32 %v616_v3, 0.0  ;;  %v628_v5 = vmax.f32 %v626_v10, 0.0 }
 0x10c   : > { %v582_v18 = vmul.f32 %v744_v6, %v568_v61 }
 0x10d   : > { %v599_v7 = vmin.f32 %v597_v4, 1.0  ;;  %v610_v8 = vmin.f32 %v608_v48, 1.0  ;;  %v620_v12 = vmin.f32 %v618_v24, 1.0  ;;  %v630_v14 = vmin.f32 %v628_v5, 1.0 }
 0x10e   : > { %v583_v21 = vmul.f32 %v744_v6, %v582_v18 }
 0x10f   : > { %602 = vst.msk [vmem:[%s1007_s7] sm:$0xff] %vm601_vm7, %v599_v7 }
 0x110   : > { %612 = vst.msk [vmem:[%s1007_s7 + $0x10] sm:$0xff] %vm601_vm7, %v610_v8  ;;  %v584_v19 = vmul.f32 0.5, %v583_v21 }
 0x111   : > { %622 = vst.msk [vmem:[%s1007_s7 + $0x20] sm:$0xff] %vm601_vm7, %v620_v12 }
 0x112   : > { %632 = vst.msk [vmem:[%s1007_s7 + $0x30] sm:$0xff] %vm601_vm7, %v630_v14  ;;  %v585_v20 = vsub.f32 1.5, %v584_v19 }
 0x114   : > { %v586_v33 = vmul.f32 %v744_v6, %v585_v20 }
 0x116   : > { %v587_v15 = vmul.f32 %v586_v33, %v568_v61 }
 0x118   : > { %v589_v17 = vsel %vm588_vm8, %v568_v61, %v587_v15 }
 0x119   : > { %v592_v26 = vsel %vm590_vm9, %v591_v22, %v589_v17 }
 0x11a   : > { %v596_v29 = vmul.f32 %v594_v16, %v592_v26  ;;  %v607_v28 = vmul.f32 %v605_v23, %v592_v26  ;;  %v617_v35 = vmul.f32 %v615_v13, %v592_v26  ;;  %v627_v32 = vmul.f32 %v625_v25, %v592_v26 }
 0x11c   : > { %v598_v36 = vmax.f32 %v596_v29, 0.0  ;;  %v609_v37 = vmax.f32 %v607_v28, 0.0  ;;  %v619_v39 = vmax.f32 %v617_v35, 0.0  ;;  %v629_v41 = vmax.f32 %v627_v32, 0.0 }
 0x11e   : > { %v600_v9 = vmin.f32 %v598_v36, 1.0  ;;  %v611_v42 = vmin.f32 %v609_v37, 1.0  ;;  %v621_v63 = vmin.f32 %v619_v39, 1.0  ;;  %v631_v49 = vmin.f32 %v629_v41, 1.0 }
 0x120   : > { %603 = vst.msk [vmem:[%s1007_s7 + $0x8] sm:$0xff] %vm601_vm7, %v600_v9 }
 0x121   : > { %613 = vst.msk [vmem:[%s1007_s7 + $0x18] sm:$0xff] %vm601_vm7, %v611_v42 }
 0x122   : > { %623 = vst.msk [vmem:[%s1007_s7 + $0x28] sm:$0xff] %vm601_vm7, %v621_v63 }
 0x123   : > { %633 = vst.msk [vmem:[%s1007_s7 + $0x38] sm:$0xff] %vm601_vm7, %v631_v49 }
 0x124 PF: > { %s14_s15 = sadd.s32 1, %s751_s15  }
 0x125   : > { %p11_p4 = scmp.ge.s32.totalorder %s14_s15, 4  }
 0x127   :  { %13 = sbr.rel (!%p11_p4) target bundleno = 1 (0x1), region = 69 }

</bundles_post_ra>
